<compile_context>
chip_gen: v6e
topology: v6e:2x2x1
jax: 0.10.0
libtpu: 0.0.40
codegen_flags: <defaults>
</compile_context>

<pallas_src>
import jax
import jax.numpy as jnp
from jax.experimental import pallas as pl
from jax.experimental.pallas import tpu as pltpu


# --------------------------- in-kernel math helpers ------------------------ #

_SQRT1_2 = 0.7071067811865476  # 1/sqrt(2)


def _erf_approx(x):
    """Abramowitz & Stegun 7.1.26 rational erf approximation, |err| <= 1.5e-7.

    exp -> EUP, reciprocal(approx) -> EUP, rest is VALU mul/add/select.
    (lax.erf has no guaranteed Pallas-TPU lowering.)"""
    p = 0.3275911
    a1, a2, a3, a4, a5 = (0.254829592, -0.284496736, 1.421413741,
                          -1.453152027, 1.061405429)
    ax = jnp.abs(x)
    t = pl.reciprocal(1.0 + p * ax, approx=True)          # EUP, off the VALU path
    poly = ((((a5 * t + a4) * t + a3) * t + a2) * t + a1) * t
    r = 1.0 - poly * jnp.exp(-(ax * ax))
    return jnp.where(x < 0.0, -r, r)


def _gelu_exact(x):
    """Exact (erf-based) GELU, matching torch.nn.GELU() default. f32 math."""
    return 0.5 * x * (1.0 + _erf_approx(x * _SQRT1_2))


# ------------------------------- Pallas kernel ----------------------------- #

def _mlp_kernel(x_ref, w1_ref, b1_ref, w2_ref, b2_ref, o_ref):
    # x_ref : (Bm, Cin)   original dtype  -- one block of flattened tokens
    # w1_ref: (Cin, H)    bf16            -- resident (single-buffered)
    # b1_ref: (1, H)      f32             -- resident
    # w2_ref: (H, Cout)   bf16            -- resident
    # b2_ref: (1, Cout)   f32             -- resident
    # o_ref : (Bm, Cout)  output dtype
    x = x_ref[...].astype(w1_ref.dtype)          # in-kernel cast (cheap VPU op)

    # fc1 (MXU, f32 accumulation) + bias
    h = jnp.dot(x, w1_ref[...], preferred_element_type=jnp.float32)
    h = h + b1_ref[...]

    # GELU (exact erf form, f32 elementwise)
    h = _gelu_exact(h)

    # fc2 (MXU, f32 accumulation) + bias
    h = h.astype(w2_ref.dtype)
    y = jnp.dot(h, w2_ref[...], preferred_element_type=jnp.float32)
    y = y + b2_ref[...]

    o_ref[...] = y.astype(o_ref.dtype)


# --------------------------------- wrapper --------------------------------- #

def _vmem_budget_bytes():
    """~75% of physical VMEM (96 MiB on v5e/v6e, 48 MiB on v7x)."""
    phys = 64 * 1024 * 1024  # conservative fallback (v7x per-TC)
    try:
        info = pltpu.get_tpu_info()
        cap = getattr(info, "vmem_capacity_bytes", None)
        if cap:
            phys = int(cap)
    except Exception:
        pass
    return (phys * 3) // 4


def _round_up(v, mult):
    return ((v + mult - 1) // mult) * mult


def mlp_pallas(x, params, *, block_rows=None, compute_dtype=jnp.bfloat16):
    """Fused MLP forward.  x: (..., Cin).  params: w1 (Cin,H), b1 (H,),
    w2 (H,Cout), b2 (Cout,).  Weights stored as (in, out): y = x @ W + b
    (equivalent to PyTorch x @ W.T + b with W stored (out, in))."""
    w1, b1, w2, b2 = params["w1"], params["b1"], params["w2"], params["b2"]
    cin = x.shape[-1]
    hidden = w1.shape[1]
    cout = w2.shape[1]
    assert w1.shape[0] == cin and w2.shape[0] == hidden

    orig_shape = x.shape
    x2d = x.reshape(-1, cin)                      # no pad, no pre-cast
    m = x2d.shape[0]

    x_bytes = jnp.dtype(x.dtype).itemsize
    out_bytes = jnp.dtype(x.dtype).itemsize

    # ---------------- row-block sizing against the VMEM budget -------------- #
    budget = _vmem_budget_bytes()
    # resident weights/biases (single-buffered, bf16 weights + f32 biases)
    fixed = 2 * (cin * hidden + hidden * cout) + 4 * (hidden + cout)
    # per-row VMEM: 2x x-block + 2x out-block + live f32/bf16 hidden intermediates
    per_row = 2 * cin * x_bytes + 2 * cout * out_bytes + 8 * hidden + 4 * cin
    bm_cap = max(16, ((budget - fixed) // max(per_row, 1)) // 16 * 16)

    target = 1024 if block_rows is None else max(16, block_rows)
    bm = min(target, bm_cap, _round_up(m, 16))
    # keep >= 2 grid steps when possible so v7x's 2 TensorCores both get work
    if m > 16:
        bm = min(bm, _round_up(pl.cdiv(m, 2), 16))
    bm = max(16, _round_up(bm, 16))               # bf16: 2 rows / sublane

    grid_len = pl.cdiv(m, bm)

    vmem_limit = int(min(budget, max(2 * (fixed + bm * per_row),
                                     32 * 1024 * 1024)))

    # bf16 MXU weights (one-time tiny cast), f32 biases
    w1c = w1.astype(compute_dtype)
    w2c = w2.astype(compute_dtype)
    b1c = b1.reshape(1, hidden).astype(jnp.float32)
    b2c = b2.reshape(1, cout).astype(jnp.float32)

    resident = dict(pipeline_mode=pl.Buffered(1))   # constant-index blocks: 1 buffer

    out = pl.pallas_call(
        _mlp_kernel,
        out_shape=jax.ShapeDtypeStruct((m, cout), x.dtype),
        grid_spec=pltpu.PrefetchScalarGridSpec(
            num_scalar_prefetch=0,
            grid=(grid_len,),
            in_specs=[
                pl.BlockSpec((bm, cin), lambda i: (i, 0)),                  # x rows
                pl.BlockSpec((cin, hidden), lambda i: (0, 0), **resident),  # w1
                pl.BlockSpec((1, hidden), lambda i: (0, 0), **resident),    # b1
                pl.BlockSpec((hidden, cout), lambda i: (0, 0), **resident), # w2
                pl.BlockSpec((1, cout), lambda i: (0, 0), **resident),      # b2
            ],
            out_specs=pl.BlockSpec((bm, cout), lambda i: (i, 0)),
        ),
        compiler_params=pltpu.CompilerParams(
            dimension_semantics=("parallel",),
            vmem_limit_bytes=vmem_limit),
    )(x2d, w1c, b1c, w2c, b2c)

    return out.reshape(*orig_shape[:-1], cout)


# ----------------------------- pure-JAX reference --------------------------- #

def mlp_ref(x, params):
    h = x @ params["w1"] + params["b1"]
    h = jax.nn.gelu(h, approximate=False)      # exact GELU, matches nn.GELU()
    return h @ params["w2"] + params["b2"]     # dropout p=0.0 -> identity


# ------------------------------------ main ---------------------------------- #

if __name__ == "__main__":
    key = jax.random.PRNGKey(0)
    B, L = 2, 64                     # batch x tokens (e.g. an 8x8 window)
    in_features = 32
    hidden_features = 128            # mlp_ratio = 4
    out_features = in_features

    kx, k1, k2, k3, k4 = jax.random.split(key, 5)
    x = jax.random.normal(kx, (B, L, in_features), jnp.float32)
    params = {
        "w1": 0.1 * jax.random.normal(k1, (in_features, hidden_features), jnp.float32),
        "b1": 0.1 * jax.random.normal(k2, (hidden_features,), jnp.float32),
        "w2": 0.1 * jax.random.normal(k3, (hidden_features, out_features), jnp.float32),
        "b2": 0.1 * jax.random.normal(k4, (out_features,), jnp.float32),
    }

    out = jax.block_until_ready(mlp_pallas(x, params))
    ref = mlp_ref(x, params)

    assert out.shape == ref.shape, (out.shape, ref.shape)
    # bf16 MXU operands with f32 accumulation -> loosened tolerance vs f32 ref
    max_err = float(jnp.max(jnp.abs(out - ref)))
    assert jnp.allclose(out, ref, atol=2e-2, rtol=2e-2), (
        "mismatch, max abs err = %e" % max_err)

    print("KERNEL_OK")
</pallas_src>

<mosaic_0001>
module attributes {stable_mosaic.version = 11 : i64} {
  func.func @_mlp_kernel(%arg0: i32, %arg1: memref<64x32xf32, #tpu.memory_space<vmem>>, %arg2: memref<32x128xbf16, #tpu.memory_space<vmem>>, %arg3: memref<1x128xf32, #tpu.memory_space<vmem>>, %arg4: memref<128x32xbf16, #tpu.memory_space<vmem>>, %arg5: memref<1x32xf32, #tpu.memory_space<vmem>>, %arg6: memref<64x32xf32, #tpu.memory_space<vmem>>) attributes {dimension_semantics = [#tpu.dimension_semantics<parallel>], iteration_bounds = array<i64: 2>, scalar_prefetch = 0 : i64, scratch_operands = 0 : i64, tpu.core_type = #tpu.core_type<tc>, window_params = [{transform_indices = @transform_0, window_bounds = array<i64: 64, 32>}, {pipeline_mode = #tpu.pipeline_mode<synchronous>, transform_indices = @transform_1, window_bounds = array<i64: 32, 128>}, {pipeline_mode = #tpu.pipeline_mode<synchronous>, transform_indices = @transform_2, window_bounds = array<i64: 1, 128>}, {pipeline_mode = #tpu.pipeline_mode<synchronous>, transform_indices = @transform_3, window_bounds = array<i64: 128, 32>}, {pipeline_mode = #tpu.pipeline_mode<synchronous>, transform_indices = @transform_4, window_bounds = array<i64: 1, 32>}, {transform_indices = @transform_5, window_bounds = array<i64: 64, 32>}]} {
    %c0 = arith.constant 0 : index
    %c0_0 = arith.constant 0 : index
    %0 = vector.load %arg1[%c0, %c0_0] : memref<64x32xf32, #tpu.memory_space<vmem>>, vector<64x32xf32>
    %1 = arith.truncf %0 : vector<64x32xf32> to vector<64x32xbf16>
    %c0_1 = arith.constant 0 : index
    %c0_2 = arith.constant 0 : index
    %2 = vector.load %arg2[%c0_1, %c0_2] : memref<32x128xbf16, #tpu.memory_space<vmem>>, vector<32x128xbf16>
    %cst = arith.constant dense<0.000000e+00> : vector<64x128xf32>
    %3 = tpu.matmul %1, %2, %cst {dimension_numbers = #tpu.dot_dimension_numbers<[1], [0], [0], [1], [0, 0, 1, 1], [], []>} : vector<64x32xbf16>, vector<32x128xbf16>, vector<64x128xf32> -> vector<64x128xf32>
    %c0_3 = arith.constant 0 : index
    %c0_4 = arith.constant 0 : index
    %4 = vector.load %arg3[%c0_3, %c0_4] : memref<1x128xf32, #tpu.memory_space<vmem>>, vector<1x128xf32>
    %5 = vector.broadcast %4 : vector<1x128xf32> to vector<64x128xf32>
    %6 = arith.addf %3, %5 : vector<64x128xf32>
    %cst_5 = arith.constant 5.000000e-01 : f32
    %7 = vector.broadcast %cst_5 : f32 to vector<64x128xf32>
    %8 = arith.mulf %7, %6 : vector<64x128xf32>
    %cst_6 = arith.constant 0.707106769 : f32
    %9 = vector.broadcast %cst_6 : f32 to vector<64x128xf32>
    %10 = arith.mulf %6, %9 : vector<64x128xf32>
    %11 = math.absf %10 : vector<64x128xf32>
    %cst_7 = arith.constant 0.327591091 : f32
    %12 = vector.broadcast %cst_7 : f32 to vector<64x128xf32>
    %13 = arith.mulf %12, %11 : vector<64x128xf32>
    %cst_8 = arith.constant 1.000000e+00 : f32
    %14 = vector.broadcast %cst_8 : f32 to vector<64x128xf32>
    %15 = arith.addf %14, %13 : vector<64x128xf32>
    %16 = tpu.reciprocal %15 {approx = true} : vector<64x128xf32> -> vector<64x128xf32>
    %cst_9 = arith.constant 1.06140542 : f32
    %17 = vector.broadcast %cst_9 : f32 to vector<64x128xf32>
    %18 = arith.mulf %17, %16 : vector<64x128xf32>
    %cst_10 = arith.constant -1.45315206 : f32
    %19 = vector.broadcast %cst_10 : f32 to vector<64x128xf32>
    %20 = arith.addf %18, %19 : vector<64x128xf32>
    %21 = arith.mulf %20, %16 : vector<64x128xf32>
    %cst_11 = arith.constant 1.42141378 : f32
    %22 = vector.broadcast %cst_11 : f32 to vector<64x128xf32>
    %23 = arith.addf %21, %22 : vector<64x128xf32>
    %24 = arith.mulf %23, %16 : vector<64x128xf32>
    %cst_12 = arith.constant -0.284496725 : f32
    %25 = vector.broadcast %cst_12 : f32 to vector<64x128xf32>
    %26 = arith.addf %24, %25 : vector<64x128xf32>
    %27 = arith.mulf %26, %16 : vector<64x128xf32>
    %cst_13 = arith.constant 0.254829586 : f32
    %28 = vector.broadcast %cst_13 : f32 to vector<64x128xf32>
    %29 = arith.addf %27, %28 : vector<64x128xf32>
    %30 = arith.mulf %29, %16 : vector<64x128xf32>
    %31 = arith.mulf %11, %11 : vector<64x128xf32>
    %cst_14 = arith.constant 0.000000e+00 : f32
    %32 = vector.broadcast %cst_14 : f32 to vector<64x128xf32>
    %33 = arith.subf %32, %31 : vector<64x128xf32>
    %34 = math.exp %33 : vector<64x128xf32>
    %35 = arith.mulf %30, %34 : vector<64x128xf32>
    %cst_15 = arith.constant 1.000000e+00 : f32
    %36 = vector.broadcast %cst_15 : f32 to vector<64x128xf32>
    %37 = arith.subf %36, %35 : vector<64x128xf32>
    %cst_16 = arith.constant 0.000000e+00 : f32
    %38 = vector.broadcast %cst_16 : f32 to vector<64x128xf32>
    %39 = arith.cmpf olt, %10, %38 : vector<64x128xf32>
    %cst_17 = arith.constant 0.000000e+00 : f32
    %40 = vector.broadcast %cst_17 : f32 to vector<64x128xf32>
    %41 = arith.subf %40, %37 : vector<64x128xf32>
    %42 = arith.select %39, %41, %37 : vector<64x128xi1>, vector<64x128xf32>
    %cst_18 = arith.constant 1.000000e+00 : f32
    %43 = vector.broadcast %cst_18 : f32 to vector<64x128xf32>
    %44 = arith.addf %43, %42 : vector<64x128xf32>
    %45 = arith.mulf %8, %44 : vector<64x128xf32>
    %46 = arith.truncf %45 : vector<64x128xf32> to vector<64x128xbf16>
    %c0_19 = arith.constant 0 : index
    %c0_20 = arith.constant 0 : index
    %47 = vector.load %arg4[%c0_19, %c0_20] : memref<128x32xbf16, #tpu.memory_space<vmem>>, vector<128x32xbf16>
    %cst_21 = arith.constant dense<0.000000e+00> : vector<64x32xf32>
    %48 = tpu.matmul %46, %47, %cst_21 {dimension_numbers = #tpu.dot_dimension_numbers<[1], [0], [0], [1], [0, 0, 1, 1], [], []>} : vector<64x128xbf16>, vector<128x32xbf16>, vector<64x32xf32> -> vector<64x32xf32>
    %c0_22 = arith.constant 0 : index
    %c0_23 = arith.constant 0 : index
    %49 = vector.load %arg5[%c0_22, %c0_23] : memref<1x32xf32, #tpu.memory_space<vmem>>, vector<1x32xf32>
    %50 = vector.broadcast %49 : vector<1x32xf32> to vector<64x32xf32>
    %51 = arith.addf %48, %50 : vector<64x32xf32>
    %c0_24 = arith.constant 0 : index
    %c0_25 = arith.constant 0 : index
    %52 = vector.load %arg6[%c0_24, %c0_25] : memref<64x32xf32, #tpu.memory_space<vmem>>, vector<64x32xf32>
    tpu.vector_store %arg6[%c0_24, %c0_25], %51 {strides = array<i32>} : memref<64x32xf32, #tpu.memory_space<vmem>>, vector<64x32xf32>,
    return
  }
  func.func @transform_0(%arg0: i32) -> (i32, i32) {
    %c0_i32 = arith.constant 0 : i32
    %c0_i32_0 = arith.constant 0 : i32
    return %arg0, %c0_i32 : i32, i32
  }
  func.func @transform_1(%arg0: i32) -> (i32, i32) {
    %c0_i32 = arith.constant 0 : i32
    %c0_i32_0 = arith.constant 0 : i32
    %c0_i32_1 = arith.constant 0 : i32
    return %c0_i32, %c0_i32_0 : i32, i32
  }
  func.func @transform_2(%arg0: i32) -> (i32, i32) {
    %c0_i32 = arith.constant 0 : i32
    %c0_i32_0 = arith.constant 0 : i32
    %c0_i32_1 = arith.constant 0 : i32
    return %c0_i32, %c0_i32_0 : i32, i32
  }
  func.func @transform_3(%arg0: i32) -> (i32, i32) {
    %c0_i32 = arith.constant 0 : i32
    %c0_i32_0 = arith.constant 0 : i32
    %c0_i32_1 = arith.constant 0 : i32
    return %c0_i32, %c0_i32_0 : i32, i32
  }
  func.func @transform_4(%arg0: i32) -> (i32, i32) {
    %c0_i32 = arith.constant 0 : i32
    %c0_i32_0 = arith.constant 0 : i32
    %c0_i32_1 = arith.constant 0 : i32
    return %c0_i32, %c0_i32_0 : i32, i32
  }
  func.func @transform_5(%arg0: i32) -> (i32, i32) {
    %c0_i32 = arith.constant 0 : i32
    %c0_i32_0 = arith.constant 0 : i32
    return %arg0, %c0_i32 : i32, i32
  }
}

</mosaic_0001>

<bundles_post_ra>
// kernel: tpu_custom_call.1
= control target key start
LH: loop header
LB: loop body
LE: loop exit
PB: predicated region body
PF: predicated region fallthrough
CT: control target
= control target key end

     0   :  { %s923_s18 = smov 0   ;;  %s1120_s0 = inlined_call_operand.vmem [shape: f32[128,32], index: 0, kind: input, shape index: {}]   ;;  %s1121_s1 = inlined_call_operand.vmem [shape: bf16[32,128], index: 1, kind: input, shape index: {}]   ;;  %s1122_s2 = inlined_call_operand.vmem [shape: f32[1,128], index: 2, kind: input, shape index: {}]   ;;  %s1123_s3 = inlined_call_operand.vmem [shape: bf16[128,32], index: 3, kind: input, shape index: {}]   ;;  %s1124_s4 = inlined_call_operand.vmem [shape: f32[1,32], index: 4, kind: input, shape index: {}]   ;;  %s1125_s5 = inlined_call_operand.vmem [shape: f32[128,32], index: 5, kind: output, shape index: {}]  }
   0x1 LB: > { %s754_s19 = sadd.s32 4294967295, %s891_s18   ;;  %p758_p0 = scmp.ge.s32.totalorder %s891_s18, 1  ;;  %s891_s18 = sphi %s923_s18, %s15_s18  }
   0x2   : > { %p188_p1 = scmp.lt.s32.totalorder %s891_s18, 3 }
   0x4   : > { %p189_p2 = pnand %p758_p0, %p188_p1 }
   0x5   : > { %s759_s22 = sshll.u32 (!%p189_p2), %s754_s19, 3 }
   0x6   : > { %192 = sbr.rel (%p189_p2) target bundleno = 487 (0x1e7), region = 40  ;;  %p217_p3 = scmp.lt.s32.totalorder (!%p189_p2), %s759_s22, 15 }
   0xb   : > { %v843_v0 = vld [vmem:[%s1121_s1 + $0x8] sm:$0xff]   ;;  %v844_v1 = vld [vmem:[%s1121_s1] sm:$0xff]   ;;  %s1127_s22 = smov (!%p217_p3, %s759_s22), 15  ;;  %vm264_vm0 = vcmask 261120   ;;  %v845_v14 = vld [vmem:[%s1123_s3 + $0x38] sm:$0xff]  }
   0xc   : > { %799 = vmatprep.subr.bf16.mxu0 %v843_v0  ;;  %s760_s25 = sshll.u32 %s1127_s22, 3  ;;  %811 = vmatprep.subr.bf16.mxu1 %v845_v14  ;;  %v846_v15 = vld [vmem:[%s1123_s3 + $0x30] sm:$0xff]   ;;  %v847_v16 = vld [vmem:[%s1123_s3 + $0x28] sm:$0xff]   ;;  %v848_v17 = vld [vmem:[%s1123_s3 + $0x20] sm:$0xff]  }
   0xd   : > { %800 = vmatpush3.bf16.msra.mxu0 %v843_v0  ;;  %s220_s28 = scalar_lea.vmem %s1120_s0, %s760_s25  ;;  %812 = vmatpush3.bf16.msra.mxu1 %v845_v14  ;;  %v849_v18 = vld [vmem:[%s1123_s3 + $0x18] sm:$0xff]   ;;  %v850_v19 = vld [vmem:[%s1123_s3 + $0x10] sm:$0xff]   ;;  %v851_v20 = vld [vmem:[%s1123_s3 + $0x8] sm:$0xff]   ;;  %s226_s29 = scalar_lea.vmem %s1125_s5, %s760_s25 }
   0xe   : > { %801 = vmatprep.subr.bf16.mxu0 %v844_v1  ;;  %v229_v2 = vld [vmem:[%s220_s28] sm:$0xff]  ;;  %v230_v3 = vld [vmem:[%s220_s28 + $0x8] sm:$0xff]  ;;  %v231_v4 = vld [vmem:[%s220_s28 + $0x10] sm:$0xff]  ;;  %813 = vmatprep.subr.bf16.mxu1 %v846_v15 }
   0xf   : > { %v237_v5 = vpack.c.bf16 %v230_v3, %v229_v2  ;;  %v232_v6 = vld [vmem:[%s220_s28 + $0x18] sm:$0xff]  ;;  %v233_v7 = vld [vmem:[%s220_s28 + $0x20] sm:$0xff]  ;;  %v234_v8 = vld [vmem:[%s220_s28 + $0x28] sm:$0xff] }
  0x10   : > { %v238_v9 = vpack.c.bf16 %v232_v6, %v231_v4  ;;  %v239_v10 = vpack.c.bf16 %v234_v8, %v233_v7  ;;  %v235_v11 = vld [vmem:[%s220_s28 + $0x30] sm:$0xff]  ;;  %v236_v12 = vld [vmem:[%s220_s28 + $0x38] sm:$0xff]  ;;  %v852_v21 = vld [vmem:[%s1123_s3] sm:$0xff]  }
  0x11   : > { %802 = vmatpush3.bf16.msra.mxu0 %v844_v1  ;;  %803 = vmatprep.mubr.msk.bf16.mxu0 %vm264_vm0, %v237_v5  ;;  %v240_v13 = vpack.c.bf16 %v236_v12, %v235_v11  ;;  %v763_v22 = vld [vmem:[%s1122_s2] ss:$0 sm:$0xff] }
  0x12   : > { %814 = vmatpush3.bf16.msra.mxu1 %v846_v15 }
  0x13   : > { %815 = vmatprep.subr.bf16.mxu1 %v847_v16 }
  0x14   : > { %804 = vmatmul.mubr.msk.bf16.vlgmr.msra.gmra.mxu0 %vm264_vm0, %v238_v9 }
  0x15   : > { %807 = vmatprep.mubr.msk.bf16.mxu0 %vm264_vm0, %v239_v10 }
  0x16   : > { %816 = vmatpush3.bf16.msra.mxu1 %v847_v16 }
  0x17   : > { %817 = vmatprep.subr.bf16.mxu1 %v848_v17 }
  0x1a   : > { %818 = vmatpush3.bf16.msra.mxu1 %v848_v17 }
  0x1b   : > { %819 = vmatprep.subr.bf16.mxu1 %v849_v18 }
  0x1c   : > { %808 = vmatmul.mubr.msk.bf16.gmra.mxu0 %vm264_vm0, %v240_v13 }
  0x1e   : > { %820 = vmatpush3.bf16.msra.mxu1 %v849_v18 }
  0x1f   : > { %821 = vmatprep.subr.bf16.mxu1 %v850_v19 }
  0x22   : > { %822 = vmatpush3.bf16.msra.mxu1 %v850_v19 }
  0x23   : > { %823 = vmatprep.subr.bf16.mxu1 %v851_v20 }
  0x26   : > { %824 = vmatpush3.bf16.msra.mxu1 %v851_v20 }
  0x27   : > { %825 = vmatprep.subr.bf16.mxu1 %v852_v21 }
  0x2a   : > { %826 = vmatpush3.bf16.msra.mxu1 %v852_v21 }
  0xd4   : > { %v805_v23 = vpop.f32.mrf.mxu0 }
  0xd5   : > { %v976_v24 = vadd.f32 %v805_v23, %v763_v22 }
  0xd6   : > { %v311_v25 = vpop.f32.mrf.mxu0 }
  0xd7   : > { %v979_v26 = vmul.f32 0.70710677, %v976_v24  ;;  %v981_v27 = vadd.f32 %v763_v22, %v311_v25 }
  0xd8   : > { %v806_v28 = vpop.f32.mrf.mxu0 }
  0xd9   : > { %v360_v29 = vand.u32 2147483647, %v979_v26  ;;  %v985_v30 = vmul.f32 0.70710677, %v981_v27  ;;  %v987_v31 = vadd.f32 %v806_v28, %v763_v22  ;;  %vm512_vm1 = vcmp.lt.f32.partialorder %v979_v26, 0.0 }
  0xda   : > { %v314_v32 = vpop.f32.mrf.mxu0 }
  0xdb   : > { %v368_v33 = vmul.f32 0.3275911, %v360_v29  ;;  %v358_v34 = vand.u32 2147483647, %v985_v30  ;;  %v991_v35 = vmul.f32 0.70710677, %v987_v31  ;;  %v993_v36 = vadd.f32 %v763_v22, %v314_v32 }
  0xdc   : > { %v809_v37 = vpop.f32.mrf.mxu0  ;;  %v464_v51 = vmul.f32 %v360_v29, %v360_v29  ;;  %vm510_vm2 = vcmp.lt.f32.partialorder %v985_v30, 0.0 }
  0xdd   : > { %v376_v38 = vadd.f32 1.0, %v368_v33  ;;  %v366_v39 = vmul.f32 0.3275911, %v358_v34  ;;  %v361_v40 = vand.u32 2147483647, %v991_v35  ;;  %v1000_v47 = vadd.f32 %v809_v37, %v763_v22 }
  0xde   : > { %v997_v41 = vmul.f32 0.70710677, %v993_v36  ;;  %v327_v42 = vpop.f32.mrf.mxu0  ;;  %v472_v58 = vsub.f32 0.0, %v464_v51  ;;  %v462_v61 = vmul.f32 %v358_v34, %v358_v34  ;;  %vm513_vm3 = vcmp.lt.f32.partialorder %v991_v35, 0.0 }
  0xdf   : > { %853 = vrcp.f32 %v376_v38  ;;  %v374_v43 = vadd.f32 1.0, %v366_v39  ;;  %v369_v44 = vmul.f32 0.3275911, %v361_v40  ;;  %v1002_v48 = vadd.f32 %v763_v22, %v327_v42 }
  0xe0   : > { %v359_v45 = vand.u32 2147483647, %v997_v41  ;;  %v810_v46 = vpop.f32.mrf.mxu0  ;;  %v1005_v52 = vmul.f32 0.70710677, %v1000_v47  ;;  %v465_v62 = vmul.f32 %v361_v40, %v361_v40  ;;  %v482_v4 = vmul.f32 1.442695, %v472_v58 }
  0xe1   : > { %855 = vrcp.f32 %v374_v43  ;;  %v377_v49 = vadd.f32 1.0, %v369_v44  ;;  %v1009_v56 = vmul.f32 0.70710677, %v1002_v48  ;;  %v1011_v57 = vadd.f32 %v810_v46, %v763_v22 }
  0xe2   : > { %v367_v50 = vmul.f32 0.3275911, %v359_v45  ;;  %v330_v54 = vpop.f32.mrf.mxu0  ;;  %v364_v55 = vand.u32 2147483647, %v1005_v52  ;;  %v470_v7 = vsub.f32 0.0, %v462_v61  ;;  %v473_v8 = vsub.f32 0.0, %v465_v62 }
  0xe3   : > { %857 = vrcp.f32 %v377_v49  ;;  %v1013_v60 = vadd.f32 %v763_v22, %v330_v54  ;;  %v362_v63 = vand.u32 2147483647, %v1009_v56  ;;  %v1017_v0 = vmul.f32 0.70710677, %v1011_v57 }
  0xe4   : > { %v375_v53 = vadd.f32 1.0, %v367_v50  ;;  %v372_v59 = vmul.f32 0.3275911, %v364_v55  ;;  %v463_v13 = vmul.f32 %v359_v45, %v359_v45  ;;  %v468_v17 = vmul.f32 %v364_v55, %v364_v55 }
  0xe5   : > { %v370_v2 = vmul.f32 0.3275911, %v362_v63  ;;  %v365_v3 = vand.u32 2147483647, %v1017_v0  ;;  %v1021_v5 = vmul.f32 0.70710677, %v1013_v60  ;;  %v466_v25 = vmul.f32 %v362_v63, %v362_v63 }
  0xe6   : > { %859 = vrcp.f32 %v375_v53  ;;  %v380_v1 = vadd.f32 1.0, %v372_v59  ;;  %v478_v19 = vmul.f32 1.442695, %v470_v7  ;;  %v484_v20 = vmul.f32 1.442695, %v473_v8 }
  0xe7   : > { %v378_v9 = vadd.f32 1.0, %v370_v2  ;;  %v373_v10 = vmul.f32 0.3275911, %v365_v3  ;;  %v363_v12 = vand.u32 2147483647, %v1021_v5  ;;  %v471_v32 = vsub.f32 0.0, %v463_v13 }
  0xe8   : > { %861 = vrcp.f32 %v380_v1  ;;  %v476_v37 = vsub.f32 0.0, %v468_v17  ;;  %v474_v43 = vsub.f32 0.0, %v466_v25  ;;  %v469_v49 = vmul.f32 %v365_v3, %v365_v3 }
  0xe9   : > { %863 = vrcp.f32 %v378_v9  ;;  %v381_v14 = vadd.f32 1.0, %v373_v10  ;;  %v371_v18 = vmul.f32 0.3275911, %v363_v12  ;;  %v480_v46 = vmul.f32 1.442695, %v471_v32 }
  0xea   : > { %865 = vpow2.f32 %v482_v4  ;;  %v490_v53 = vmul.f32 1.442695, %v476_v37  ;;  %v1043_v58 = vmul.f32 0.5, %v981_v27  ;;  %v467_v61 = vmul.f32 %v363_v12, %v363_v12 }
  0xeb   : > { %867 = vrcp.f32 %v381_v14  ;;  %v379_v28 = vadd.f32 1.0, %v371_v18  ;;  %v486_v2 = vmul.f32 1.442695, %v474_v43  ;;  %v477_v7 = vsub.f32 0.0, %v469_v49 }
  0xec   : > { %v1023_v6 = vpop.eup %853  ;;  %v475_v14 = vsub.f32 0.0, %v467_v61  ;;  %vm511_vm4 = vcmp.lt.f32.partialorder %v997_v41, 0.0  ;;  %vm514_vm5 = vcmp.lt.f32.partialorder %v1009_v56, 0.0  ;;  %vm516_vm6 = vcmp.lt.f32.partialorder %v1005_v52, 0.0 }
  0xed   : > { %v392_v11 = vmul.f32 1.0614054, %v1023_v6  ;;  %869 = vrcp.f32 %v379_v28  ;;  %v492_v28 = vmul.f32 1.442695, %v477_v7  ;;  %vm517_vm7 = vcmp.lt.f32.partialorder %v1017_v0, 0.0 }
  0xee   : > { %v1027_v15 = vpop.eup %855  ;;  %871 = vpow2.f32 %v478_v19  ;;  %vm515_vm8 = vcmp.lt.f32.partialorder %v1021_v5, 0.0  ;;  %v349_v56 = vmul.f32 0.5, %v1011_v57  ;;  %v346_v52 = vmul.f32 0.5, %v1002_v48  ;;  %v770_v57 = vld [vmem:[%s1124_s4] ss:$0 sm:$0xff] }
  0xef   : > { %v400_v16 = vadd.f32 -1.4531521, %v392_v11  ;;  %v390_v21 = vmul.f32 1.0614054, %v1027_v15  ;;  %873 = vpow2.f32 %v484_v20 }
  0xf0   : > { %v1030_v22 = vpop.eup %857  ;;  %875 = vpow2.f32 %v480_v46 }
  0xf1   : > { %v408_v23 = vmul.f32 %v1023_v6, %v400_v16  ;;  %v393_v29 = vmul.f32 1.0614054, %v1030_v22  ;;  %v398_v33 = vadd.f32 -1.4531521, %v390_v21  ;;  %877 = vpow2.f32 %v490_v53 }
  0xf2   : > { %879 = vpow2.f32 %v486_v2 }
  0xf3   : > { %v416_v34 = vadd.f32 1.4214138, %v408_v23  ;;  %v1034_v38 = vpop.eup %859  ;;  %v401_v39 = vadd.f32 -1.4531521, %v393_v29  ;;  %v406_v40 = vmul.f32 %v1027_v15, %v398_v33  ;;  %881 = vpow2.f32 %v492_v28 }
  0xf4   : > { %v391_v44 = vmul.f32 1.0614054, %v1034_v38 }
  0xf5   : > { %v424_v42 = vmul.f32 %v1023_v6, %v416_v34  ;;  %v409_v45 = vmul.f32 %v1030_v22, %v401_v39  ;;  %v414_v50 = vadd.f32 1.4214138, %v406_v40  ;;  %v1040_v55 = vpop.eup %861 }
  0xf6   : > { %v399_v54 = vadd.f32 -1.4531521, %v391_v44  ;;  %v396_v1 = vmul.f32 1.0614054, %v1040_v55  ;;  %v1050_v9 = vpop.eup %863 }
  0xf7   : > { %v432_v51 = vadd.f32 -0.28449672, %v424_v42  ;;  %v417_v59 = vadd.f32 1.4214138, %v409_v45  ;;  %v422_v62 = vmul.f32 %v1027_v15, %v414_v50  ;;  %v394_v13 = vmul.f32 1.0614054, %v1050_v9  ;;  %v866_v17 = vpop.eup %865 }
  0xf8   : > { %v407_v3 = vmul.f32 %v1034_v38, %v399_v54  ;;  %v404_v10 = vadd.f32 -1.4531521, %v396_v1  ;;  %v1057_v21 = vpop.eup %867  ;;  %v488_v42 = vmul.f32 1.442695, %v475_v14 }
  0xf9   : > { %v440_v63 = vmul.f32 %v1023_v6, %v432_v51  ;;  %v425_v4 = vmul.f32 %v1030_v22, %v417_v59  ;;  %v430_v8 = vadd.f32 -0.28449672, %v422_v62  ;;  %v402_v25 = vadd.f32 -1.4531521, %v394_v13 }
  0xfa   : > { %v415_v11 = vadd.f32 1.4214138, %v407_v3  ;;  %v412_v19 = vmul.f32 %v1040_v55, %v404_v10  ;;  %v397_v34 = vmul.f32 1.0614054, %v1057_v21  ;;  %v1061_v39 = vpop.eup %869  ;;  %883 = vpow2.f32 %v488_v42 }
  0xfb   : > { %v448_v27 = vadd.f32 0.2548296, %v440_v63  ;;  %v433_v12 = vadd.f32 -0.28449672, %v425_v4  ;;  %v438_v16 = vmul.f32 %v1027_v15, %v430_v8  ;;  %v410_v40 = vmul.f32 %v1050_v9, %v402_v25  ;;  %v872_v44 = vpop.eup %871 }
  0xfc   : > { %v423_v20 = vmul.f32 %v1034_v38, %v415_v11  ;;  %v420_v33 = vadd.f32 1.4214138, %v412_v19  ;;  %v405_v49 = vadd.f32 -1.4531521, %v397_v34  ;;  %v395_v50 = vmul.f32 1.0614054, %v1061_v39  ;;  %v874_v51 = vpop.eup %873 }
  0xfd   : > { %v456_v18 = vmul.f32 %v1023_v6, %v448_v27  ;;  %v441_v23 = vmul.f32 %v1030_v22, %v433_v12  ;;  %v446_v29 = vadd.f32 0.2548296, %v438_v16  ;;  %v418_v54 = vadd.f32 1.4214138, %v410_v40  ;;  %v876_v13 = vpop.eup %875 }
  0xfe   : > { %v431_v37 = vadd.f32 -0.28449672, %v423_v20  ;;  %v428_v46 = vmul.f32 %v1040_v55, %v420_v33  ;;  %v413_v63 = vmul.f32 %v1057_v21, %v405_v49  ;;  %v878_v19 = vpop.eup %877 }
  0xff   : > { %v496_v32 = vmul.f32 %v866_v17, %v456_v18  ;;  %v449_v6 = vadd.f32 0.2548296, %v441_v23  ;;  %v454_v43 = vmul.f32 %v1027_v15, %v446_v29  ;;  %v403_v15 = vadd.f32 -1.4531521, %v395_v50 }
 0x100   : > { %v439_v59 = vmul.f32 %v1034_v38, %v431_v37  ;;  %v436_v62 = vadd.f32 -0.28449672, %v428_v46  ;;  %v426_v2 = vmul.f32 %v1050_v9, %v418_v54  ;;  %v421_v8 = vadd.f32 1.4214138, %v413_v63 }
 0x101   : > { %v504_v45 = vsub.f32 1.0, %v496_v32  ;;  %v457_v53 = vmul.f32 %v1030_v22, %v449_v6  ;;  %v494_v61 = vmul.f32 %v872_v44, %v454_v43  ;;  %v411_v27 = vmul.f32 %v1061_v39, %v403_v15  ;;  %v880_v32 = vpop.eup %879 }
 0x102   : > { %v447_v3 = vadd.f32 0.2548296, %v439_v59  ;;  %v444_v7 = vmul.f32 %v1040_v55, %v436_v62  ;;  %v434_v11 = vadd.f32 -0.28449672, %v426_v2  ;;  %v429_v16 = vmul.f32 %v1057_v21, %v421_v8  ;;  %v882_v63 = vpop.eup %881 }
 0x103   : > { %v497_v1 = vmul.f32 %v874_v51, %v457_v53  ;;  %v502_v4 = vsub.f32 1.0, %v494_v61  ;;  %v520_v22 = vsub.f32 0.0, %v504_v45  ;;  %v419_v17 = vadd.f32 1.4214138, %v411_v27 }
 0x104   : > { %v455_v12 = vmul.f32 %v1034_v38, %v447_v3  ;;  %v452_v14 = vadd.f32 0.2548296, %v444_v7  ;;  %v442_v23 = vmul.f32 %v1050_v9, %v434_v11  ;;  %v437_v29 = vadd.f32 -0.28449672, %v429_v16 }
 0x105   : > { %v505_v10 = vsub.f32 1.0, %v497_v1  ;;  %v518_v18 = vsub.f32 0.0, %v502_v4  ;;  %v427_v38 = vmul.f32 %v1061_v39, %v419_v17  ;;  %v528_v40 = vsel %vm512_vm1, %v520_v22, %v504_v45 }
 0x106   : > { %v495_v25 = vmul.f32 %v876_v13, %v455_v12  ;;  %v460_v28 = vmul.f32 %v1040_v55, %v452_v14  ;;  %v450_v34 = vadd.f32 0.2548296, %v442_v23  ;;  %v445_v42 = vmul.f32 %v1057_v21, %v437_v29 }
 0x107   : > { %v521_v20 = vsub.f32 0.0, %v505_v10  ;;  %v526_v6 = vsel %vm510_vm2, %v518_v18, %v502_v4  ;;  %v435_v43 = vadd.f32 -0.28449672, %v427_v38  ;;  %v345_v44 = vmul.f32 0.5, %v987_v31  ;;  %v884_v7 = vpop.eup %883 }
 0x108   : > { %v503_v37 = vsub.f32 1.0, %v495_v25  ;;  %v500_v30 = vmul.f32 %v878_v19, %v460_v28  ;;  %v458_v55 = vmul.f32 %v1050_v9, %v450_v34  ;;  %v453_v49 = vadd.f32 0.2548296, %v445_v42 }
 0x109   : > { %v529_v33 = vsel %vm513_vm3, %v521_v20, %v505_v10  ;;  %v443_v50 = vmul.f32 %v1061_v39, %v435_v43  ;;  %v534_v51 = vadd.f32 1.0, %v526_v6  ;;  %v536_v53 = vadd.f32 1.0, %v528_v40 }
 0x10a   : > { %v537_v35 = vadd.f32 1.0, %v529_v33  ;;  %v519_v46 = vsub.f32 0.0, %v503_v37  ;;  %v508_v54 = vsub.f32 1.0, %v500_v30  ;;  %v498_v26 = vmul.f32 %v880_v32, %v458_v55 }
 0x10b   : > { %v343_v59 = vmul.f32 0.5, %v993_v36  ;;  %v461_v61 = vmul.f32 %v1057_v21, %v453_v49  ;;  %v451_v62 = vadd.f32 0.2548296, %v443_v50  ;;  %v344_v9 = vmul.f32 0.5, %v976_v24 }
 0x10c   : > { %v527_v45 = vsel %vm511_vm4, %v519_v46, %v503_v37  ;;  %v545_v15 = vmul.f32 %v537_v35, %v345_v44  ;;  %v506_v1 = vsub.f32 1.0, %v498_v26  ;;  %v542_v3 = vmul.f32 %v534_v51, %v1043_v58 }
 0x10d   : > { %v535_v31 = vadd.f32 1.0, %v527_v45  ;;  %v501_v41 = vmul.f32 %v882_v63, %v461_v61  ;;  %v459_v2 = vmul.f32 %v1061_v39, %v451_v62  ;;  %v544_v8 = vmul.f32 %v536_v53, %v344_v9 }
 0x10e   : > { %v524_v27 = vsub.f32 0.0, %v508_v54  ;;  %v522_v22 = vsub.f32 0.0, %v506_v1  ;;  %v347_v20 = vmul.f32 0.5, %v1013_v60  ;;  %v348_v25 = vmul.f32 0.5, %v1000_v47 }
 0x10f   : > { %v543_v4 = vmul.f32 %v535_v31, %v343_v59  ;;  %v509_v36 = vsub.f32 1.0, %v501_v41  ;;  %v499_v10 = vmul.f32 %v884_v7, %v459_v2  ;;  %v551_v11 = vpack.c.bf16 %v545_v15, %v544_v8 }
 0x110   : > { %v530_v24 = vsel %vm514_vm5, %v522_v22, %v506_v1  ;;  %v532_v39 = vsel %vm516_vm6, %v524_v27, %v508_v54 }
 0x111   : > { %v550_v21 = vpack.c.bf16 %v543_v4, %v542_v3  ;;  %v525_v12 = vsub.f32 0.0, %v509_v36  ;;  %v507_v13 = vsub.f32 1.0, %v499_v10  ;;  %v538_v16 = vadd.f32 1.0, %v530_v24 }
 0x112   : > { %v540_v18 = vadd.f32 1.0, %v532_v39 }
 0x113   : > { %827 = vmatprep.mubr.bf16.mxu1 %v550_v21  ;;  %v533_v58 = vsel %vm517_vm7, %v525_v12, %v509_v36  ;;  %v523_v14 = vsub.f32 0.0, %v507_v13  ;;  %v546_v28 = vmul.f32 %v538_v16, %v346_v52 }
 0x114   : > { %828 = vmatmul.mubr.bf16.vlgmr.msra.gmra.mxu1 %v551_v11  ;;  %v541_v17 = vadd.f32 1.0, %v533_v58  ;;  %v548_v38 = vmul.f32 %v540_v18, %v348_v25 }
 0x115   : > { %v531_v19 = vsel %vm515_vm8, %v523_v14, %v507_v13 }
 0x116   : > { %v539_v23 = vadd.f32 1.0, %v531_v19  ;;  %v549_v0 = vmul.f32 %v541_v17, %v349_v56 }
 0x118   : > { %v547_v29 = vmul.f32 %v539_v23, %v347_v20  ;;  %v553_v33 = vpack.c.bf16 %v549_v0, %v548_v38 }
 0x11a   : > { %v552_v32 = vpack.c.bf16 %v547_v29, %v546_v28 }
 0x11c   : > { %831 = vmatprep.mubr.bf16.mxu1 %v552_v32 }
 0x11d   : > { %832 = vmatmul.mubr.bf16.gmra.mxu1 %v553_v33 }
 0x1d4   : > { %v829_v48 = vpop.f32.mrf.mxu1 }
 0x1d5   : > { %v668_v60 = vadd.f32 %v829_v48, %v770_v57 }
 0x1d6   : > { %v659_v47 = vpop.f32.mrf.mxu1 }
 0x1d7   : > { %692 = vst.msk [vmem:[%s226_s29 + $0x10] sm:$0xff] %vm264_vm0, %v668_v60  ;;  %v660_v5 = vadd.f32 %v770_v57, %v659_v47 }
 0x1d8   : > { %v830_v34 = vpop.f32.mrf.mxu1 }
 0x1d9   : > { %690 = vst.msk [vmem:[%s226_s29] sm:$0xff] %vm264_vm0, %v660_v5  ;;  %v671_v37 = vadd.f32 %v830_v34, %v770_v57 }
 0x1da   : > { %v662_v6 = vpop.f32.mrf.mxu1 }
 0x1db   : > { %693 = vst.msk [vmem:[%s226_s29 + $0x18] sm:$0xff] %vm264_vm0, %v671_v37  ;;  %v663_v40 = vadd.f32 %v770_v57, %v662_v6 }
 0x1dd   : > { %691 = vst.msk [vmem:[%s226_s29 + $0x8] sm:$0xff] %vm264_vm0, %v663_v40  ;;  %v833_v30 = vpop.f32.mrf.mxu1 }
 0x1de   : > { %v684_v42 = vadd.f32 %v833_v30, %v770_v57 }
 0x1df   : > { %v675_v43 = vpop.f32.mrf.mxu1 }
 0x1e0   : > { %696 = vst.msk [vmem:[%s226_s29 + $0x30] sm:$0xff] %vm264_vm0, %v684_v42  ;;  %v676_v44 = vadd.f32 %v770_v57, %v675_v43 }
 0x1e1   : > { %v834_v35 = vpop.f32.mrf.mxu1 }
 0x1e2   : > { %694 = vst.msk [vmem:[%s226_s29 + $0x20] sm:$0xff] %vm264_vm0, %v676_v44  ;;  %v687_v55 = vadd.f32 %v834_v35, %v770_v57 }
 0x1e3   : > { %v678_v46 = vpop.f32.mrf.mxu1 }
 0x1e4   : > { %697 = vst.msk [vmem:[%s226_s29 + $0x38] sm:$0xff] %vm264_vm0, %v687_v55  ;;  %v679_v49 = vadd.f32 %v770_v57, %v678_v46 }
 0x1e6   : > { %695 = vst.msk [vmem:[%s226_s29 + $0x28] sm:$0xff] %vm264_vm0, %v679_v49 }
 0x1e7 PF: > { %s15_s18 = sadd.s32 1, %s891_s18  }
 0x1e8   : > { %p12_p4 = scmp.ge.s32.totalorder %s15_s18, 4  }
 0x1ea   :  { %14 = sbr.rel (!%p12_p4) target bundleno = 1 (0x1), region = 70 }

</bundles_post_ra>
